<compile_context>
chip_gen: v5e
topology: v5e:2x2
jax: 0.10.0
libtpu: 0.0.40
codegen_flags: <defaults>
</compile_context>

<pallas_src>
import functools

import jax
import jax.numpy as jnp
from jax.experimental import pallas as pl
from jax.experimental.pallas import tpu as pltpu


def _round_up(x, m):
    return ((x + m - 1) // m) * m


def _attention_decoder_kernel(
    state_ref,   # (2, H)  f32  : row 0 = embedded token, row 1 = previous hidden
    enc_ref,     # (L, H)  f32  : encoder outputs
    we_ref,      # (H, L+H)   bf16 : [W_attn_emb | W_combine_emb]
    wh_ref,      # (H, L+3H)  bf16 : [W_attn_hid | W_hr | W_hz | W_hn]
    wca_ref,     # (H, H)     bf16 : W_combine_attn
    wgi_ref,     # (H, 3H)    bf16 : [W_ir | W_iz | W_in]
    wo_ref,      # (H, Vp)    bf16 : output projection, zero-padded to Vp lanes
    b_ref,       # (1, Vp+L+5H) f32 : [b_out | b_attn | b_comb | b_ir+b_hr,b_iz+b_hz | b_in | b_hn]
    logp_ref,    # (1, Vp) f32
    newh_ref,    # (1, H)  f32
):
    f32 = jnp.float32
    bf16 = jnp.bfloat16
    H = newh_ref.shape[1]
    L = enc_ref.shape[0]
    Vp = logp_ref.shape[1]

    state = state_ref[...]                       # (2, H)
    emb = state[0:1, :]
    hid = state[1:2, :]
    emb_b = emb.astype(bf16)
    hid_b = hid.astype(bf16)

    bias = b_ref[...]                            # (1, Vp + L + 5H)
    b_out  = bias[:, 0:Vp]
    b_attn = bias[:, Vp:Vp + L]
    b_comb = bias[:, Vp + L:Vp + L + H]
    b_rz   = bias[:, Vp + L + H:Vp + L + 3 * H]          # [b_ir+b_hr | b_iz+b_hz]
    b_in   = bias[:, Vp + L + 3 * H:Vp + L + 4 * H]
    b_hn   = bias[:, Vp + L + 4 * H:Vp + L + 5 * H]

    # Two fused matmuls cover every product against emb / hid; the hid-side
    # work is independent of the softmax so it overlaps it.
    e_proj = jnp.dot(emb_b, we_ref[...], preferred_element_type=f32)   # (1, L+H)
    h_proj = jnp.dot(hid_b, wh_ref[...], preferred_element_type=f32)   # (1, L+3H)

    # --- attention weights: softmax over max_length ---
    scores = e_proj[:, 0:L] + h_proj[:, 0:L] + b_attn                  # (1, L)
    scores = scores - jnp.max(scores, axis=-1, keepdims=True)
    p = jnp.exp(scores)
    attn_w = p * pl.reciprocal(jnp.sum(p, axis=-1, keepdims=True), approx=True)

    # --- attn_applied = attn_w @ encoder_outputs  -> (1, H) ---
    attn_applied = jnp.dot(attn_w, enc_ref[...], preferred_element_type=f32)

    # --- attn_combine + ReLU ---
    comb = (e_proj[:, L:L + H] + b_comb
            + jnp.dot(attn_applied.astype(bf16), wca_ref[...],
                      preferred_element_type=f32))                     # (1, H)
    x = jnp.maximum(comb, 0.0)

    # --- GRU cell (PyTorch gate order r, z, n), fused input-side matmul ---
    gi = jnp.dot(x.astype(bf16), wgi_ref[...], preferred_element_type=f32)  # (1, 3H)
    hr = h_proj[:, L:L + H]
    hz = h_proj[:, L + H:L + 2 * H]
    hn = h_proj[:, L + 2 * H:L + 3 * H]
    r = jax.nn.sigmoid(gi[:, 0:H] + hr + b_rz[:, 0:H])
    z = jax.nn.sigmoid(gi[:, H:2 * H] + hz + b_rz[:, H:2 * H])
    n = jnp.tanh(gi[:, 2 * H:3 * H] + b_in + r * (hn + b_hn))
    h_new = (1.0 - z) * n + z * hid                                    # (1, H)
    newh_ref[...] = h_new

    # --- output projection + log_softmax (padding lanes hold a -1e30 bias,
    #     so they contribute 0 to the normalizer and are sliced off later) ---
    logits = jnp.dot(h_new.astype(bf16), wo_ref[...],
                     preferred_element_type=f32) + b_out               # (1, Vp)
    m = jnp.max(logits, axis=-1, keepdims=True)
    shifted = logits - m
    lse = jnp.log(jnp.sum(jnp.exp(shifted), axis=-1, keepdims=True))
    logp_ref[...] = shifted - lse


def _full_spec(shape):
    # whole-array block, single grid point
    return pl.BlockSpec(shape, lambda: (0,) * len(shape))


@functools.partial(jax.jit, static_argnames=("hidden_size", "vocab_size", "max_length"))
def attention_decoder_forward(token, hidden, encoder_outputs, params,
                              *, hidden_size, vocab_size, max_length):
    """token: () int32; hidden: (1, 1, H); encoder_outputs: (L, H); params packed.

    Returns (log_probs (1, V), new_hidden (1, 1, H)) — matches the PyTorch
    module's forward (dropout treated as inference-mode identity).
    """
    H, V, L = hidden_size, vocab_size, max_length
    Vp = params["w_out"].shape[1]            # vocab padded to a multiple of 128

    # --- glue: embedding row gather (dropout is identity at inference) ---
    # TODO(synk): dropout_p=0.1 is a no-op here (eval mode); no RNG mask applied.
    embedded = jnp.take(params["embedding"], token, axis=0).reshape(1, H)
    state = jnp.concatenate([embedded, hidden.reshape(1, H)], axis=0)   # (2, H)

    inputs = (state, encoder_outputs,
              params["w_emb"], params["w_hid"], params["w_ca"],
              params["w_gi"], params["w_out"], params["bias"])

    log_probs_p, new_hidden = pl.pallas_call(
        _attention_decoder_kernel,
        out_shape=(jax.ShapeDtypeStruct((1, Vp), jnp.float32),
                   jax.ShapeDtypeStruct((1, H), jnp.float32)),
        in_specs=[_full_spec(a.shape) for a in inputs],
        out_specs=(_full_spec((1, Vp)), _full_spec((1, H))),
        compiler_params=pltpu.CompilerParams(vmem_limit_bytes=32 * 1024 * 1024),
    )(*inputs)

    return log_probs_p[:, :V], new_hidden.reshape(1, 1, H)


def init_raw_params(key, hidden_size, vocab_size, max_length):
    """Deterministic synthetic parameters with the PyTorch module's shapes
    (Linear weights stored transposed as (in, out))."""
    H, V, L = hidden_size, vocab_size, max_length
    keys = jax.random.split(key, 16)
    s = 0.1

    def nrm(k, shape):
        return (s * jax.random.normal(k, shape)).astype(jnp.float32)

    return {
        "embedding": nrm(keys[0], (V, H)),
        # attn: Linear(2H -> L); split into embedded-half and hidden-half
        "w_attn_e": nrm(keys[1], (H, L)),
        "w_attn_h": nrm(keys[2], (H, L)),
        "b_attn":   nrm(keys[3], (1, L)),
        # attn_combine: Linear(2H -> H); split into embedded-half and attn-half
        "w_comb_e": nrm(keys[4], (H, H)),
        "w_comb_a": nrm(keys[5], (H, H)),
        "b_comb":   nrm(keys[6], (1, H)),
        # GRU (gate order r, z, n)
        "w_ir": nrm(keys[7], (H, H)), "w_iz": nrm(keys[8], (H, H)), "w_in": nrm(keys[9], (H, H)),
        "b_ir": nrm(keys[10], (1, H)), "b_iz": nrm(keys[11], (1, H)), "b_in": nrm(keys[12], (1, H)),
        "w_hr": nrm(keys[13], (H, H)), "w_hz": nrm(keys[14], (H, H)), "w_hn": nrm(keys[15], (H, H)),
        "b_hr": jnp.zeros((1, H), jnp.float32),
        "b_hz": jnp.zeros((1, H), jnp.float32),
        "b_hn": jnp.zeros((1, H), jnp.float32),
        # out: Linear(H -> V)
        "w_out": nrm(jax.random.fold_in(key, 100), (H, V)),
        "b_out": nrm(jax.random.fold_in(key, 101), (1, V)),
    }


def pack_params(raw, hidden_size, vocab_size, max_length, weight_dtype=jnp.bfloat16):
    """Host-side (one-time) weight fusion / bias packing for the kernel."""
    H, V, L = hidden_size, vocab_size, max_length
    Vp = _round_up(V, 128)

    w_emb = jnp.concatenate([raw["w_attn_e"], raw["w_comb_e"]], axis=1)              # (H, L+H)
    w_hid = jnp.concatenate([raw["w_attn_h"], raw["w_hr"], raw["w_hz"], raw["w_hn"]],
                            axis=1)                                                  # (H, L+3H)
    w_gi = jnp.concatenate([raw["w_ir"], raw["w_iz"], raw["w_in"]], axis=1)          # (H, 3H)
    w_out = jnp.pad(raw["w_out"], ((0, 0), (0, Vp - V)))                             # (H, Vp)

    b_out = jnp.pad(raw["b_out"], ((0, 0), (0, Vp - V)), constant_values=-1e30)
    b_rz = jnp.concatenate([raw["b_ir"] + raw["b_hr"], raw["b_iz"] + raw["b_hz"]], axis=1)
    bias = jnp.concatenate([b_out, raw["b_attn"], raw["b_comb"], b_rz,
                            raw["b_in"], raw["b_hn"]], axis=1).astype(jnp.float32)   # (1, Vp+L+5H)

    return {
        "embedding": raw["embedding"],
        "w_emb": w_emb.astype(weight_dtype),
        "w_hid": w_hid.astype(weight_dtype),
        "w_ca":  raw["w_comb_a"].astype(weight_dtype),
        "w_gi":  w_gi.astype(weight_dtype),
        "w_out": w_out.astype(weight_dtype),
        "bias":  bias,
    }


if __name__ == "__main__":
    HIDDEN = 32
    VOCAB = 64
    MAX_LEN = 8

    key = jax.random.PRNGKey(0)
    k_par, k_hid, k_enc = jax.random.split(key, 3)

    raw_params = init_raw_params(k_par, HIDDEN, VOCAB, MAX_LEN)
    params = pack_params(raw_params, HIDDEN, VOCAB, MAX_LEN)

    token = jnp.array(5, dtype=jnp.int32)                                   # single input token
    hidden = jax.random.normal(k_hid, (1, 1, HIDDEN), dtype=jnp.float32)    # GRU hidden state
    encoder_outputs = jax.random.normal(k_enc, (MAX_LEN, HIDDEN), dtype=jnp.float32)

    log_probs, new_hidden = attention_decoder_forward(
        token, hidden, encoder_outputs, params,
        hidden_size=HIDDEN, vocab_size=VOCAB, max_length=MAX_LEN)
    jax.block_until_ready((log_probs, new_hidden))

    # sanity: log_softmax rows should exponentiate-sum to 1
    assert log_probs.shape == (1, VOCAB)
    assert new_hidden.shape == (1, 1, HIDDEN)
    assert abs(float(jnp.sum(jnp.exp(log_probs))) - 1.0) < 1e-3

    print("KERNEL_OK")
</pallas_src>

<mosaic_0001>
module attributes {stable_mosaic.version = 11 : i64} {
  func.func @_attention_decoder_kernel(%arg0: memref<2x32xf32, #tpu.memory_space<vmem>>, %arg1: memref<8x32xf32, #tpu.memory_space<vmem>>, %arg2: memref<32x40xbf16, #tpu.memory_space<vmem>>, %arg3: memref<32x104xbf16, #tpu.memory_space<vmem>>, %arg4: memref<32x32xbf16, #tpu.memory_space<vmem>>, %arg5: memref<32x96xbf16, #tpu.memory_space<vmem>>, %arg6: memref<32x128xbf16, #tpu.memory_space<vmem>>, %arg7: memref<1x296xf32, #tpu.memory_space<vmem>>, %arg8: memref<1x128xf32, #tpu.memory_space<vmem>>, %arg9: memref<1x32xf32, #tpu.memory_space<vmem>>) attributes {dimension_semantics = [], scalar_prefetch = 0 : i64, scratch_operands = 0 : i64, tpu.core_type = #tpu.core_type<tc>} {
    %c0 = arith.constant 0 : index
    %c0_0 = arith.constant 0 : index
    %0 = vector.load %arg0[%c0, %c0_0] : memref<2x32xf32, #tpu.memory_space<vmem>>, vector<2x32xf32>
    %1 = vector.extract_strided_slice %0 {offsets = [0, 0], sizes = [1, 32], strides = [1, 1]} : vector<2x32xf32> to vector<1x32xf32>
    %2 = vector.extract_strided_slice %0 {offsets = [1, 0], sizes = [1, 32], strides = [1, 1]} : vector<2x32xf32> to vector<1x32xf32>
    %3 = arith.truncf %1 : vector<1x32xf32> to vector<1x32xbf16>
    %4 = arith.truncf %2 : vector<1x32xf32> to vector<1x32xbf16>
    %c0_1 = arith.constant 0 : index
    %c0_2 = arith.constant 0 : index
    %5 = vector.load %arg7[%c0_1, %c0_2] : memref<1x296xf32, #tpu.memory_space<vmem>>, vector<1x296xf32>
    %6 = vector.extract_strided_slice %5 {offsets = [0, 0], sizes = [1, 128], strides = [1, 1]} : vector<1x296xf32> to vector<1x128xf32>
    %7 = vector.extract_strided_slice %5 {offsets = [0, 128], sizes = [1, 8], strides = [1, 1]} : vector<1x296xf32> to vector<1x8xf32>
    %8 = vector.extract_strided_slice %5 {offsets = [0, 136], sizes = [1, 32], strides = [1, 1]} : vector<1x296xf32> to vector<1x32xf32>
    %9 = vector.extract_strided_slice %5 {offsets = [0, 168], sizes = [1, 64], strides = [1, 1]} : vector<1x296xf32> to vector<1x64xf32>
    %10 = vector.extract_strided_slice %5 {offsets = [0, 232], sizes = [1, 32], strides = [1, 1]} : vector<1x296xf32> to vector<1x32xf32>
    %11 = vector.extract_strided_slice %5 {offsets = [0, 264], sizes = [1, 32], strides = [1, 1]} : vector<1x296xf32> to vector<1x32xf32>
    %c0_3 = arith.constant 0 : index
    %c0_4 = arith.constant 0 : index
    %12 = vector.load %arg2[%c0_3, %c0_4] : memref<32x40xbf16, #tpu.memory_space<vmem>>, vector<32x40xbf16>
    %cst = arith.constant dense<0.000000e+00> : vector<1x40xf32>
    %13 = tpu.matmul %3, %12, %cst {dimension_numbers = #tpu.dot_dimension_numbers<[1], [0], [0], [1], [0, 0, 1, 1], [], []>} : vector<1x32xbf16>, vector<32x40xbf16>, vector<1x40xf32> -> vector<1x40xf32>
    %c0_5 = arith.constant 0 : index
    %c0_6 = arith.constant 0 : index
    %14 = vector.load %arg3[%c0_5, %c0_6] : memref<32x104xbf16, #tpu.memory_space<vmem>>, vector<32x104xbf16>
    %cst_7 = arith.constant dense<0.000000e+00> : vector<1x104xf32>
    %15 = tpu.matmul %4, %14, %cst_7 {dimension_numbers = #tpu.dot_dimension_numbers<[1], [0], [0], [1], [0, 0, 1, 1], [], []>} : vector<1x32xbf16>, vector<32x104xbf16>, vector<1x104xf32> -> vector<1x104xf32>
    %16 = vector.extract_strided_slice %13 {offsets = [0, 0], sizes = [1, 8], strides = [1, 1]} : vector<1x40xf32> to vector<1x8xf32>
    %17 = vector.extract_strided_slice %15 {offsets = [0, 0], sizes = [1, 8], strides = [1, 1]} : vector<1x104xf32> to vector<1x8xf32>
    %18 = arith.addf %16, %17 : vector<1x8xf32>
    %19 = arith.addf %18, %7 : vector<1x8xf32>
    %cst_8 = arith.constant dense<0xFF800000> : vector<1xf32>
    %20 = vector.multi_reduction <maximumf>, %19, %cst_8 [1] : vector<1x8xf32> to vector<1xf32>
    %21 = vector.shape_cast %20 : vector<1xf32> to vector<1x1xf32>
    %22 = vector.broadcast %21 : vector<1x1xf32> to vector<1x8xf32>
    %23 = arith.subf %19, %22 : vector<1x8xf32>
    %24 = math.exp %23 : vector<1x8xf32>
    %cst_9 = arith.constant dense<0.000000e+00> : vector<1xf32>
    %25 = vector.multi_reduction <add>, %24, %cst_9 [1] : vector<1x8xf32> to vector<1xf32>
    %26 = vector.shape_cast %25 : vector<1xf32> to vector<1x1xf32>
    %27 = tpu.reciprocal %26 {approx = true} : vector<1x1xf32> -> vector<1x1xf32>
    %28 = vector.broadcast %27 : vector<1x1xf32> to vector<1x8xf32>
    %29 = arith.mulf %24, %28 : vector<1x8xf32>
    %c0_10 = arith.constant 0 : index
    %c0_11 = arith.constant 0 : index
    %30 = vector.load %arg1[%c0_10, %c0_11] : memref<8x32xf32, #tpu.memory_space<vmem>>, vector<8x32xf32>
    %cst_12 = arith.constant dense<0.000000e+00> : vector<1x32xf32>
    %31 = tpu.matmul %29, %30, %cst_12 {dimension_numbers = #tpu.dot_dimension_numbers<[1], [0], [0], [1], [0, 0, 1, 1], [], []>} : vector<1x8xf32>, vector<8x32xf32>, vector<1x32xf32> -> vector<1x32xf32>
    %32 = vector.extract_strided_slice %13 {offsets = [0, 8], sizes = [1, 32], strides = [1, 1]} : vector<1x40xf32> to vector<1x32xf32>
    %33 = arith.addf %32, %8 : vector<1x32xf32>
    %34 = arith.truncf %31 : vector<1x32xf32> to vector<1x32xbf16>
    %c0_13 = arith.constant 0 : index
    %c0_14 = arith.constant 0 : index
    %35 = vector.load %arg4[%c0_13, %c0_14] : memref<32x32xbf16, #tpu.memory_space<vmem>>, vector<32x32xbf16>
    %cst_15 = arith.constant dense<0.000000e+00> : vector<1x32xf32>
    %36 = tpu.matmul %34, %35, %cst_15 {dimension_numbers = #tpu.dot_dimension_numbers<[1], [0], [0], [1], [0, 0, 1, 1], [], []>} : vector<1x32xbf16>, vector<32x32xbf16>, vector<1x32xf32> -> vector<1x32xf32>
    %37 = arith.addf %33, %36 : vector<1x32xf32>
    %cst_16 = arith.constant 0.000000e+00 : f32
    %38 = vector.broadcast %cst_16 : f32 to vector<1x32xf32>
    %39 = arith.maximumf %37, %38 : vector<1x32xf32>
    %40 = arith.truncf %39 : vector<1x32xf32> to vector<1x32xbf16>
    %c0_17 = arith.constant 0 : index
    %c0_18 = arith.constant 0 : index
    %41 = vector.load %arg5[%c0_17, %c0_18] : memref<32x96xbf16, #tpu.memory_space<vmem>>, vector<32x96xbf16>
    %cst_19 = arith.constant dense<0.000000e+00> : vector<1x96xf32>
    %42 = tpu.matmul %40, %41, %cst_19 {dimension_numbers = #tpu.dot_dimension_numbers<[1], [0], [0], [1], [0, 0, 1, 1], [], []>} : vector<1x32xbf16>, vector<32x96xbf16>, vector<1x96xf32> -> vector<1x96xf32>
    %43 = vector.extract_strided_slice %15 {offsets = [0, 8], sizes = [1, 32], strides = [1, 1]} : vector<1x104xf32> to vector<1x32xf32>
    %44 = vector.extract_strided_slice %15 {offsets = [0, 40], sizes = [1, 32], strides = [1, 1]} : vector<1x104xf32> to vector<1x32xf32>
    %45 = vector.extract_strided_slice %15 {offsets = [0, 72], sizes = [1, 32], strides = [1, 1]} : vector<1x104xf32> to vector<1x32xf32>
    %46 = vector.extract_strided_slice %42 {offsets = [0, 0], sizes = [1, 32], strides = [1, 1]} : vector<1x96xf32> to vector<1x32xf32>
    %47 = arith.addf %46, %43 : vector<1x32xf32>
    %48 = vector.extract_strided_slice %9 {offsets = [0, 0], sizes = [1, 32], strides = [1, 1]} : vector<1x64xf32> to vector<1x32xf32>
    %49 = arith.addf %47, %48 : vector<1x32xf32>
    %50 = arith.negf %49 : vector<1x32xf32>
    %51 = math.exp %50 : vector<1x32xf32>
    %cst_20 = arith.constant 1.000000e+00 : f32
    %52 = vector.broadcast %cst_20 : f32 to vector<1x32xf32>
    %53 = arith.addf %52, %51 : vector<1x32xf32>
    %54 = arith.divf %52, %53 : vector<1x32xf32>
    %55 = vector.extract_strided_slice %42 {offsets = [0, 32], sizes = [1, 32], strides = [1, 1]} : vector<1x96xf32> to vector<1x32xf32>
    %56 = arith.addf %55, %44 : vector<1x32xf32>
    %57 = vector.extract_strided_slice %9 {offsets = [0, 32], sizes = [1, 32], strides = [1, 1]} : vector<1x64xf32> to vector<1x32xf32>
    %58 = arith.addf %56, %57 : vector<1x32xf32>
    %59 = arith.negf %58 : vector<1x32xf32>
    %60 = math.exp %59 : vector<1x32xf32>
    %cst_21 = arith.constant 1.000000e+00 : f32
    %61 = vector.broadcast %cst_21 : f32 to vector<1x32xf32>
    %62 = arith.addf %61, %60 : vector<1x32xf32>
    %63 = arith.divf %61, %62 : vector<1x32xf32>
    %64 = vector.extract_strided_slice %42 {offsets = [0, 64], sizes = [1, 32], strides = [1, 1]} : vector<1x96xf32> to vector<1x32xf32>
    %65 = arith.addf %64, %10 : vector<1x32xf32>
    %66 = arith.addf %45, %11 : vector<1x32xf32>
    %67 = arith.mulf %54, %66 : vector<1x32xf32>
    %68 = arith.addf %65, %67 : vector<1x32xf32>
    %69 = math.tanh %68 : vector<1x32xf32>
    %cst_22 = arith.constant 1.000000e+00 : f32
    %70 = vector.broadcast %cst_22 : f32 to vector<1x32xf32>
    %71 = arith.subf %70, %63 : vector<1x32xf32>
    %72 = arith.mulf %71, %69 : vector<1x32xf32>
    %73 = arith.mulf %63, %2 : vector<1x32xf32>
    %74 = arith.addf %72, %73 : vector<1x32xf32>
    %c0_23 = arith.constant 0 : index
    %c0_24 = arith.constant 0 : index
    %75 = vector.load %arg9[%c0_23, %c0_24] : memref<1x32xf32, #tpu.memory_space<vmem>>, vector<1x32xf32>
    tpu.vector_store %arg9[%c0_23, %c0_24], %74 {strides = array<i32>} : memref<1x32xf32, #tpu.memory_space<vmem>>, vector<1x32xf32>,
    %76 = arith.truncf %74 : vector<1x32xf32> to vector<1x32xbf16>
    %c0_25 = arith.constant 0 : index
    %c0_26 = arith.constant 0 : index
    %77 = vector.load %arg6[%c0_25, %c0_26] : memref<32x128xbf16, #tpu.memory_space<vmem>>, vector<32x128xbf16>
    %cst_27 = arith.constant dense<0.000000e+00> : vector<1x128xf32>
    %78 = tpu.matmul %76, %77, %cst_27 {dimension_numbers = #tpu.dot_dimension_numbers<[1], [0], [0], [1], [0, 0, 1, 1], [], []>} : vector<1x32xbf16>, vector<32x128xbf16>, vector<1x128xf32> -> vector<1x128xf32>
    %79 = arith.addf %78, %6 : vector<1x128xf32>
    %cst_28 = arith.constant dense<0xFF800000> : vector<1xf32>
    %80 = vector.multi_reduction <maximumf>, %79, %cst_28 [1] : vector<1x128xf32> to vector<1xf32>
    %81 = vector.shape_cast %80 : vector<1xf32> to vector<1x1xf32>
    %82 = vector.broadcast %81 : vector<1x1xf32> to vector<1x128xf32>
    %83 = arith.subf %79, %82 : vector<1x128xf32>
    %84 = math.exp %83 : vector<1x128xf32>
    %cst_29 = arith.constant dense<0.000000e+00> : vector<1xf32>
    %85 = vector.multi_reduction <add>, %84, %cst_29 [1] : vector<1x128xf32> to vector<1xf32>
    %86 = vector.shape_cast %85 : vector<1xf32> to vector<1x1xf32>
    %87 = math.log %86 : vector<1x1xf32>
    %88 = vector.broadcast %87 : vector<1x1xf32> to vector<1x128xf32>
    %89 = arith.subf %83, %88 : vector<1x128xf32>
    %c0_30 = arith.constant 0 : index
    %c0_31 = arith.constant 0 : index
    %90 = vector.load %arg8[%c0_30, %c0_31] : memref<1x128xf32, #tpu.memory_space<vmem>>, vector<1x128xf32>
    tpu.vector_store %arg8[%c0_30, %c0_31], %89 {strides = array<i32>} : memref<1x128xf32, #tpu.memory_space<vmem>>, vector<1x128xf32>,
    return
  }
}

</mosaic_0001>

<bundles_post_ra>
// kernel: attention_decoder_forward.1
= control target key start
LH: loop header
LB: loop body
LE: loop exit
PB: predicated region body
PF: predicated region fallthrough
CT: control target
= control target key end

     0   :  { %15 = vsyncpa [#allocation3], 0  ;;  %s628_s0 = inlined_call_operand.vmem [shape: f32[2,32], index: 0, kind: input, shape index: {}]   ;;  %s629_s1 = inlined_call_operand.vmem [shape: f32[8,32], index: 1, kind: input, shape index: {}]   ;;  %s630_s2 = inlined_call_operand.vmem [shape: bf16[32,40], index: 2, kind: input, shape index: {}]   ;;  %s631_s3 = inlined_call_operand.vmem [shape: bf16[32,104], index: 3, kind: input, shape index: {}]   ;;  %s632_s4 = inlined_call_operand.vmem [shape: bf16[32,32], index: 4, kind: input, shape index: {}]   ;;  %s633_s5 = inlined_call_operand.vmem [shape: bf16[32,96], index: 5, kind: input, shape index: {}]   ;;  %s634_s6 = inlined_call_operand.vmem [shape: bf16[32,128], index: 6, kind: input, shape index: {}]   ;;  %s635_s7 = inlined_call_operand.vmem [shape: f32[1,296], index: 7, kind: input, shape index: {}]   ;;  %s636_s8 = inlined_call_operand.hbm [shape: f32[1,128], index: 8, kind: output, shape index: {0}]   ;;  %s637_s9 = inlined_call_operand.hbm [shape: f32[1,32], index: 9, kind: output, shape index: {1}]  }
   0x1   :  { %v421_v0 = vld [vmem:[%s630_s2 + $0x8] sm:$0xff]  ;;  %v573_v2 = vld [vmem:[%s628_s0] sm:$0x3] }
   0x2   :  { %v423_v1 = vld [vmem:[%s631_s3 + $0x8] sm:$0xff]  ;;  %v578_v3 = vld [vmem:[%s635_s7] sm:$0x7]  ;;  %63 = vmatpush.bf16.msra.mxu0 %v421_v0  ;;  %v35_v6 = vpack.c.bf16 %v573_v2, %v573_v2 }
   0x3   :  { %97 = vmatpush.bf16.msra.mxu1 %v423_v1  ;;  %v420_v4 = vld [vmem:[%s630_s2] sm:$0xff]  ;;  %v250_v7 = vperm.slane %v578_v3, 2 }
   0x4   :  { %v422_v5 = vld [vmem:[%s631_s3] sm:$0xff] }
   0x5   :  { %16 = vsyncpa [#allocation5], 0  ;;  %s505_s0 = smov 64   ;;  %v74_v8 = vshrl.u32 %v35_v6, 16  ;;  %vm53_vm0 = vcmask 261120   ;;  %v106_v11 = vperm.slane %v578_v3, 1 }
   0x6   :  { %257 = vrot.lane.b32.xlu2 %v250_v7, %s505_s0  ;;  %64 = vmatpush.bf16.msra.mxu0 %v420_v4  ;;  %s506_s2 = smov 120   ;;  %vm109_vm1 = vcmask 57344   ;;  %v121_v22 = vld [vmem:[%s629_s1] sm:$0xff]  ;;  %v425_v23 = vld [vmem:[%s632_s4 + $0x8] sm:$0xff]  ;;  %vm122_vm2 = vcmask 64512   ;;  %s507_s1 = smov 8  }
   0x7   :  { %98 = vmatpush.bf16.msra.mxu1 %v422_v5  ;;  %141 = vmatpush.msra.mxu2 %v121_v22  ;;  %v424_v27 = vld [vmem:[%s632_s4] sm:$0xff]  ;;  %v427_v32 = vld [vmem:[%s633_s5 + $0x8] sm:$0xff]  ;;  %s508_s4 = smov 88   ;;  %s509_s29 = smov 56   ;;  %v279_v63 = vrot.slane %v573_v2, 1  ;;  %vm253_vm7 = vcmask 719872  }
   0x8   :  { %173 = vmatpush.bf16.msra.mxu3 %v425_v23  ;;  %v426_v33 = vld [vmem:[%s633_s5] sm:$0xff]  ;;  %s510_s5 = smov 32   ;;  %s511_s30 = smov 96   ;;  %vm289_vm8 = vcmask 253952   ;;  %vm327_vm9 = vcmask 1040384  }
   0x9   :  { %381 = vmatmul.msk.bf16.vlgmr.msra.gmra.mxu0 %vm53_vm0, %v35_v6  ;;  %215 = vmatpush.bf16.msrb.mxu2 %v427_v32  ;;  %v428_v2 = vld [vmem:[%s634_s6] sm:$0xff]  ;;  %s359_s17 = sshll.u32 %s637_s9, 4  ;;  %s513_s18 = smov [#allocation2]   ;;  %s360_s17 = int_to_ptr.hbm [resolvable:$true] %s359_s17 }
   0xa   :  { %390 = vmatmul.msk.bf16.vlgmr.msra.gmra.mxu1 %vm53_vm0, %v74_v8  ;;  %v429_v8 = vld [vmem:[%s634_s6 + $0x8] sm:$0xff]  ;;  %s512_s6 = smov [#allocation4]   ;;  %s346_s19 = sshll.u32 %s513_s18, 4  ;;  %s347_s19 = int_to_ptr.vmem [resolvable:$true] %s346_s19 }
   0xb   :  { %320 = vmatpush.bf16.msrb.mxu0 %v429_v8  ;;  %s357_s14 = sshll.u32 %s512_s6, 4  ;;  %s358_s14 = int_to_ptr.vmem [resolvable:$true] %s357_s14 }
   0xc   :  { %174 = vmatpush.bf16.msra.mxu3 %v424_v27 }
   0xd   :  { %216 = vmatpush.bf16.msrb.mxu2 %v426_v33 }
   0xf   :  { %321 = vmatpush.bf16.msrb.mxu0 %v428_v2 }
  0x60   :  { %v258_v39 = vpop.permute.xlu2 %257 }
  0x86   :  { %v66_v9 = vpop.f32.mrf.mxu0 }
  0x87   :  { %v100_v10 = vpop.f32.mrf.mxu1  ;;  %v146_v34 = vadd.f32 %v106_v11, %v66_v9 }
  0x88   :  { %v104_v12 = vadd.f32 %v100_v10, %v66_v9  ;;  %223 = vrot.lane.b32.xlu2 %v100_v10, %s506_s2  ;;  %v260_v40 = vadd.f32 %v258_v39, %v100_v10 }
  0x8a   :  { %v108_v13 = vadd.f32 %v106_v11, %v104_v12 }
  0x8c   :  { %v110_v14 = vsel %vm109_vm1, %v108_v13, -inf }
  0x8d   :  { %111 = vmax.xlane.f32.xlu0 %v110_v14 }
  0x8e   :  { %v68_v15 = vpop.f32.mrf.mxu0 }
  0x8f   :  { %v102_v16 = vpop.f32.mrf.mxu1 }
  0x90   :  { %251 = vrot.lane.b32.xlu2 %v250_v7, %s508_s4 }
  0xe2   :  { %v224_v42 = vpop.permute.xlu2 %223 }
  0xea   :  { %v252_v0 = vpop.permute.xlu2 %251 }
 0x100   :  { %v112_v17 = vpop.xlane.xlu0 %111 }
 0x101   :  { %v113_v18 = vsub.f32 %v108_v13, %v112_v17 }
 0x103   :  { %v114_v19 = vmul.f32 1.442695, %v113_v18 }
 0x105   :  { %439 = vpow2.f32 %v114_v19 }
 0x10b   :  { %v440_v20 = vpop.eup %439 }
 0x10c   :  { %v116_v21 = vsel %vm109_vm1, %v440_v20, 0.0 }
 0x10d   :  { %117 = vadd.xlane.f32.xlu0 %v116_v21 }
 0x121   :  { %227 = vrot.lane.b32.xlu0 %v106_v11, %s508_s4 }
 0x180   :  { %v118_v24 = vpop.xlane.xlu0 %117 }
 0x181   :  { %441 = vrcp.f32 %v118_v24 }
 0x187   :  { %v442_v25 = vpop.eup %441 }
 0x188   :  { %v120_v26 = vmul.f32 %v442_v25, %v440_v20 }
 0x18a   :  { %391 = vmatmul.msk.f32.vlgmr.msra.gmra.mxu2 %vm122_vm2, %v120_v26 }
 0x193   :  { %v228_v45 = vpop.permute.xlu0 %227 }
 0x194   :  { %v254_v1 = vsel %vm253_vm7, %v228_v45, %v252_v0 }
 0x20d   :  { %v143_v28 = vpop.f32.mrf.mxu2 }
 0x20e   :  { %v147_v29 = vpack.c.bf16 %v143_v28, %v143_v28 }
 0x210   :  { %400 = vmatmul.msk.bf16.vlgmr.msra.gmra.mxu3 %vm53_vm0, %v147_v29 }
 0x293   :  { %v176_v30 = vpop.f32.mrf.mxu3 }
 0x294   :  { %181 = vrot.lane.b32.xlu1 %v176_v30, %s507_s1 }
 0x29b   :  { %v178_v31 = vpop.f32.mrf.mxu3 }
 0x306   :  { %v182_v35 = vpop.permute.xlu1 %181 }
 0x307   :  { %v184_v36 = vadd.f32 %v182_v35, %v146_v34 }
 0x309   :  { %v185_v37 = vmax.f32 %v184_v36, 0.0 }
 0x30b   :  { %v186_v38 = vpack.c.bf16 %v185_v37, %v185_v37 }
 0x30d   :  { %192 = vrot.lane.b32.xlu1 %v186_v38, %s506_s2  ;;  %s348_s2 = sshll.u32 %s636_s8, 4  ;;  %s349_s2 = int_to_ptr.hbm [resolvable:$true] %s348_s2 }
 0x315   :  { %262 = vrot.lane.b32.xlu1 %v260_v40, %s509_s29 }
 0x37f   :  { %v193_v41 = vpop.permute.xlu1 %192 }
 0x380   :  { %409 = vmatmul.msk.bf16.vlgmr.msrb.gmra.mxu2 %vm53_vm0, %v193_v41 }
 0x387   :  { %v263_v60 = vpop.permute.xlu1 %262 }
 0x403   :  { %v218_v43 = vpop.f32.mrf.mxu2 }
 0x404   :  { %v226_v44 = vadd.f32 %v224_v42, %v218_v43  ;;  %v256_v4 = vadd.f32 %v254_v1, %v218_v43 }
 0x406   :  { %v230_v46 = vadd.f32 %v228_v45, %v226_v44 }
 0x408   :  { %v410_v47 = vmul.f32 -1.442695, %v230_v46 }
 0x40a   :  { %443 = vpow2.f32 %v410_v47 }
 0x40b   :  { %v220_v48 = vpop.f32.mrf.mxu2 }
 0x410   :  { %v444_v49 = vpop.eup %443 }
 0x411   :  { %v234_v50 = vadd.f32 1.0, %v444_v49 }
 0x413   :  { %445 = vrcp.f32 %v234_v50  ;;  %v246_v54 = vand.u32 2147483648, %v234_v50  ;;  %v244_v56 = vand.u32 2147483647, %v234_v50  ;;  %vm240_vm4 = vweird.f32 %v234_v50 }
 0x415   :  { %v247_v58 = vor.u32 1.1754944e-38, %v246_v54  ;;  %vm245_vm6 = vcmp.eq.f32.partialorder %v244_v56, 8.507059e+37 }
 0x419   :  { %v446_v51 = vpop.eup %445 }
 0x41a   :  { %v236_v52 = vmul.f32 %v446_v51, %v234_v50  ;;  %vm241_vm3 = vweird.f32 %v446_v51 }
 0x41b   :  { %vm242_vm5 = vmor %vm240_vm4, %vm241_vm3 }
 0x41c   :  { %v237_v53 = vsub.f32 1.0, %v236_v52 }
 0x41e   :  { %v238_v55 = vmul.f32 %v446_v51, %v237_v53 }
 0x420   :  { %v239_v57 = vadd.f32 %v446_v51, %v238_v55 }
 0x422   :  { %v243_v59 = vsel %vm242_vm5, %v446_v51, %v239_v57 }
 0x423   :  { %v248_v61 = vsel %vm245_vm6, %v247_v58, %v243_v59 }
 0x424   :  { %v265_v62 = vmul.f32 %v263_v60, %v248_v61  ;;  %v272_v10 = vsub.f32 1.0, %v248_v61 }
 0x426   :  { %267 = vrot.lane.b32.xlu1 %v265_v62, %s505_s0 }
 0x42e   :  { %280 = vrot.lane.b32.xlu1 %v279_v63, %s510_s5 }
 0x498   :  { %v268_v5 = vpop.permute.xlu1 %267 }
 0x499   :  { %v270_v6 = vadd.f32 %v268_v5, %v256_v4 }
 0x49b   :  { %447 = vtanh.f32 %v270_v6 }
 0x4a0   :  { %v281_v9 = vpop.permute.xlu1 %280 }
 0x4a1   :  { %v448_v7 = vpop.eup %447  ;;  %v283_v12 = vmul.f32 %v281_v9, %v248_v61 }
 0x4a2   :  { %274 = vrot.lane.b32.xlu2 %v448_v7, %s511_s30 }
 0x4fc   :  { %v275_v11 = vpop.permute.xlu2 %274 }
 0x4fd   :  { %v277_v13 = vmul.f32 %v275_v11, %v272_v10 }
 0x4ff   :  { %v284_v14 = vadd.f32 %v283_v12, %v277_v13 }
 0x501   :  { %v291_v15 = vpack.c.bf16 %v284_v14, %v284_v14 }
 0x503   :  { %297 = vrot.lane.b32.xlu2 %v291_v15, %s511_s30 }
 0x50b   :  { %286 = vrot.lane.b32.xlu2 %v284_v14, %s511_s30 }
 0x55d   :  { %v298_v16 = vpop.permute.xlu2 %297 }
 0x55e   :  { %419 = vmatmul.msk.bf16.vlgmr.msrb.gmra.mxu0 %vm53_vm0, %v298_v16 }
 0x565   :  { %v287_v17 = vpop.permute.xlu2 %286 }
 0x566   :  { %290 = vst.msk [vmem:[#allocation4] sm:$0x1] %vm289_vm8, %v287_v17 }
 0x567   :  { %362 = dma.vmem_to_hbm [thread:$0]  %s358_s14, 16, %s360_s17, [#allocation5]  }
 0x5db   :  { %v323_v18 = vpop.f32.mrf.mxu0 }
 0x5dc   :  { %v324_v19 = vadd.f32 %v323_v18, %v578_v3 }
 0x5de   :  { %v328_v20 = vsel %vm327_vm9, %v324_v19, -inf }
 0x5df   :  { %329 = vmax.xlane.f32.xlu0 %v328_v20 }
 0x5e3   :  { %v325_v21 = vpop.f32.mrf.mxu0 }
 0x652   :  { %v330_v22 = vpop.xlane.xlu0 %329 }
 0x653   :  { %v331_v23 = vsub.f32 %v324_v19, %v330_v22 }
 0x655   :  { %v332_v24 = vmul.f32 1.442695, %v331_v23 }
 0x657   :  { %449 = vpow2.f32 %v332_v24 }
 0x65d   :  { %v450_v25 = vpop.eup %449 }
 0x65e   :  { %v334_v26 = vsel %vm327_vm9, %v450_v25, 0.0 }
 0x65f   :  { %335 = vadd.xlane.f32.xlu1 %v334_v26 }
 0x6d2   :  { %v336_v3 = vpop.xlane.xlu1 %335 }
 0x6d3   :  { %451 = vlog2.f32 %v336_v3 }
 0x6d9   :  { %v452_v27 = vpop.eup %451 }
 0x6da   :  { %v338_v28 = vmul.f32 0.6931472, %v452_v27 }
 0x6dc   :  { %v339_v29 = vsub.f32 %v331_v23, %v338_v28 }
 0x6de   :  { %340 = vst [vmem:[#allocation2] sm:$0x1] %v339_v29 }
 0x6df   :  { %351 = dma.vmem_to_hbm [thread:$0]  %s347_s19, 16, %s349_s2, [#allocation3]  }
 0x6e0   :  { %501 = dma.done.wait [#allocation3], 16  }
 0x6e1   :  { %502 = vsyncadd [#allocation3], 4294967280 }
 0x6e2   :  { %503 = dma.done.wait [#allocation5], 16  }
 0x6e3   :  { %504 = vsyncadd [#allocation5], 4294967280 }
 0x6e4   :  { %371 = vsyncpa [#allocation3], 1 }
 0x6e5   :  { %372 = vsyncpa [#allocation5], 1 }

</bundles_post_ra>
